<compile_context>
chip_gen: v7x
topology: tpu7x:2x2x1
jax: 0.10.0
libtpu: 0.0.40
codegen_flags: <defaults>
</compile_context>

<pallas_src>
import jax
import jax.numpy as jnp
from jax.experimental import pallas as pl
from jax.experimental.pallas import tpu as pltpu

IN_FEATURES = 28 * 28        # 784
NUM_CLASSES = 10
PADDED_CLASSES = 128         # lane-dense output width (one full vreg lane dim)
NEG_PAD = -1e30              # finite "-inf" bias for the padded class columns
MAX_TILE_B = 1024            # per-tile HBM time >> ~0.35us per-step overhead


def _mnist_svm_kernel(x_ref, w_ref, b_ref, o_ref):
    # x_ref: (TB, 784) f32/bf16 ; w_ref: (784, 128) bf16 ; b_ref: (1, 128) f32
    x = x_ref[...].astype(jnp.bfloat16)          # VPU cast, hidden under DMA
    logits = jnp.dot(x, w_ref[...],
                     preferred_element_type=jnp.float32) + b_ref[...]
    # Numerically stable log-softmax over the (padded) class axis.
    # Padded columns carry bias -1e30 -> exp(shifted) == 0, so columns 0..9 are
    # identical to log_softmax over the real 10 classes.
    m = jnp.max(logits, axis=-1, keepdims=True)
    shifted = logits - m
    lse = jnp.log(jnp.sum(jnp.exp(shifted), axis=-1, keepdims=True))
    o_ref[...] = shifted - lse


def _round_up(x, m):
    return (x + m - 1) // m * m


def prepare_params(weight, bias):
    """Transpose / pad / cast ONCE, outside the hot path.

    weight: (10, 784) f32, bias: (10,) f32
      -> w_pad: (784, 128) bf16 (zero-padded cols), b_pad: (1, 128) f32.
    """
    w_t = weight.astype(jnp.float32).T                              # (784, 10)
    w_pad = jnp.zeros((IN_FEATURES, PADDED_CLASSES), jnp.float32)
    w_pad = w_pad.at[:, :NUM_CLASSES].set(w_t)
    b_pad = jnp.full((1, PADDED_CLASSES), NEG_PAD, jnp.float32)
    b_pad = b_pad.at[0, :NUM_CLASSES].set(bias.astype(jnp.float32))
    return w_pad.astype(jnp.bfloat16), b_pad


@jax.jit
def mnist_svm_forward(x, w_pad, b_pad):
    """x: (B, 1, 28, 28) or (B, 784); w_pad/b_pad from prepare_params."""
    x2d = x.reshape(-1, IN_FEATURES)
    if x2d.dtype != jnp.bfloat16:          # accept bf16 straight through
        x2d = x2d.astype(jnp.float32)      # no-op if already f32
    B = x2d.shape[0]

    # Batch tile: <= MAX_TILE_B, at least 2 grid steps once B is big enough
    # (v7x dual-TC), multiple of 16 (bf16/f32 sublane alignment) or == B.
    tb = min(MAX_TILE_B, _round_up(pl.cdiv(B, 2), 16))
    if tb >= B:
        tb = B                              # single full block (exact dims OK)
    grid = (pl.cdiv(B, tb),)                # partial tail block is masked

    itemsize = x2d.dtype.itemsize
    cost = pl.CostEstimate(
        flops=2 * B * IN_FEATURES * PADDED_CLASSES,
        transcendentals=B * PADDED_CLASSES,
        bytes_accessed=(B * IN_FEATURES * itemsize
                        + IN_FEATURES * PADDED_CLASSES * 2
                        + B * PADDED_CLASSES * 4))

    out = pl.pallas_call(
        _mnist_svm_kernel,
        out_shape=jax.ShapeDtypeStruct((B, PADDED_CLASSES), jnp.float32),
        grid=grid,
        in_specs=[
            pl.BlockSpec((tb, IN_FEATURES), lambda i: (i, 0)),
            # Constant block index -> weight/bias stay resident in VMEM.
            pl.BlockSpec((IN_FEATURES, PADDED_CLASSES), lambda i: (0, 0)),
            pl.BlockSpec((1, PADDED_CLASSES), lambda i: (0, 0)),
        ],
        out_specs=pl.BlockSpec((tb, PADDED_CLASSES), lambda i: (i, 0)),
        compiler_params=pltpu.CompilerParams(
            dimension_semantics=("parallel",),   # 2 TCs on v7x; no-op v5e/v6e
            vmem_limit_bytes=32 * 1024 * 1024),
        cost_estimate=cost,
    )(x2d, w_pad, b_pad)

    return out[:, :NUM_CLASSES]


def init_params(key):
    # nn.Linear(784, 10) init: weight (10, 784), bias (10,),
    # uniform(-1/sqrt(784), 1/sqrt(784)).
    kw, kb = jax.random.split(key)
    bound = 1.0 / jnp.sqrt(jnp.float32(IN_FEATURES))
    weight = jax.random.uniform(kw, (NUM_CLASSES, IN_FEATURES),
                                jnp.float32, -bound, bound)
    bias = jax.random.uniform(kb, (NUM_CLASSES,), jnp.float32, -bound, bound)
    return weight, bias


def _reference(x, weight, bias):
    logits = x.reshape(-1, IN_FEATURES).astype(jnp.float32) @ weight.T + bias
    return jax.nn.log_softmax(logits, axis=-1)


if __name__ == "__main__":
    key = jax.random.PRNGKey(0)
    kx, kp, kx2, kx3 = jax.random.split(key, 4)
    weight, bias = init_params(kp)
    w_pad, b_pad = prepare_params(weight, bias)

    # bf16 matmul vs f32 reference: loosen tolerance (K=784, f32 accumulation).
    TOL = dict(atol=3e-2, rtol=3e-2)

    # Main run: NCHW input like PyTorch MNIST.
    B = 8
    x = jax.random.normal(kx, (B, 1, 28, 28), jnp.float32)
    out = jax.block_until_ready(mnist_svm_forward(x, w_pad, b_pad))
    assert out.shape == (B, NUM_CLASSES)
    assert jnp.allclose(out, _reference(x, weight, bias), **TOL)

    # Ragged batch (not a multiple of 8): single exact-size block, no padding.
    B2 = 5
    x2 = jax.random.normal(kx2, (B2, 1, 28, 28), jnp.float32)
    out2 = jax.block_until_ready(mnist_svm_forward(x2, w_pad, b_pad))
    assert out2.shape == (B2, NUM_CLASSES)
    assert jnp.allclose(out2, _reference(x2, weight, bias), **TOL)

    # Multi-step grid with a masked partial tail block (tb=32, 2 grid steps).
    B3 = 37
    x3 = jax.random.normal(kx3, (B3, IN_FEATURES), jnp.float32)
    out3 = jax.block_until_ready(mnist_svm_forward(x3, w_pad, b_pad))
    assert out3.shape == (B3, NUM_CLASSES)
    assert jnp.allclose(out3, _reference(x3, weight, bias), **TOL)

    print("KERNEL_OK")
</pallas_src>

<mosaic_0001>
module attributes {stable_mosaic.version = 11 : i64} {
  func.func @_mnist_svm_kernel(%arg0: i32, %arg1: memref<8x784xf32, #tpu.memory_space<vmem>>, %arg2: memref<784x128xbf16, #tpu.memory_space<vmem>>, %arg3: memref<1x128xf32, #tpu.memory_space<vmem>>, %arg4: memref<8x128xf32, #tpu.memory_space<vmem>>) attributes {dimension_semantics = [#tpu.dimension_semantics<parallel>], iteration_bounds = array<i64: 1>, scalar_prefetch = 0 : i64, scratch_operands = 0 : i64, tpu.core_type = #tpu.core_type<tc>, window_params = [{transform_indices = @transform_0, window_bounds = array<i64: 8, 784>}, {pipeline_mode = #tpu.pipeline_mode<synchronous>, transform_indices = @transform_1, window_bounds = array<i64: 784, 128>}, {pipeline_mode = #tpu.pipeline_mode<synchronous>, transform_indices = @transform_2, window_bounds = array<i64: 1, 128>}, {transform_indices = @transform_3, window_bounds = array<i64: 8, 128>}]} {
    %c0 = arith.constant 0 : index
    %c0_0 = arith.constant 0 : index
    %0 = vector.load %arg1[%c0, %c0_0] : memref<8x784xf32, #tpu.memory_space<vmem>>, vector<8x784xf32>
    %1 = arith.truncf %0 : vector<8x784xf32> to vector<8x784xbf16>
    %c0_1 = arith.constant 0 : index
    %c0_2 = arith.constant 0 : index
    %2 = vector.load %arg2[%c0_1, %c0_2] : memref<784x128xbf16, #tpu.memory_space<vmem>>, vector<784x128xbf16>
    %cst = arith.constant dense<0.000000e+00> : vector<8x128xf32>
    %3 = tpu.matmul %1, %2, %cst {dimension_numbers = #tpu.dot_dimension_numbers<[1], [0], [0], [1], [0, 0, 1, 1], [], []>} : vector<8x784xbf16>, vector<784x128xbf16>, vector<8x128xf32> -> vector<8x128xf32>
    %c0_3 = arith.constant 0 : index
    %c0_4 = arith.constant 0 : index
    %4 = vector.load %arg3[%c0_3, %c0_4] : memref<1x128xf32, #tpu.memory_space<vmem>>, vector<1x128xf32>
    %5 = vector.broadcast %4 : vector<1x128xf32> to vector<8x128xf32>
    %6 = arith.addf %3, %5 : vector<8x128xf32>
    %cst_5 = arith.constant dense<0xFF800000> : vector<8xf32>
    %7 = vector.multi_reduction <maximumf>, %6, %cst_5 [1] : vector<8x128xf32> to vector<8xf32>
    %8 = vector.shape_cast %7 : vector<8xf32> to vector<8x1xf32>
    %9 = vector.broadcast %8 : vector<8x1xf32> to vector<8x128xf32>
    %10 = arith.subf %6, %9 : vector<8x128xf32>
    %11 = math.exp %10 : vector<8x128xf32>
    %cst_6 = arith.constant dense<0.000000e+00> : vector<8xf32>
    %12 = vector.multi_reduction <add>, %11, %cst_6 [1] : vector<8x128xf32> to vector<8xf32>
    %13 = vector.shape_cast %12 : vector<8xf32> to vector<8x1xf32>
    %14 = math.log %13 : vector<8x1xf32>
    %15 = vector.broadcast %14 : vector<8x1xf32> to vector<8x128xf32>
    %16 = arith.subf %10, %15 : vector<8x128xf32>
    %c0_7 = arith.constant 0 : index
    %c0_8 = arith.constant 0 : index
    %17 = vector.load %arg4[%c0_7, %c0_8] : memref<8x128xf32, #tpu.memory_space<vmem>>, vector<8x128xf32>
    tpu.vector_store %arg4[%c0_7, %c0_8], %16 {strides = array<i32>} : memref<8x128xf32, #tpu.memory_space<vmem>>, vector<8x128xf32>,
    return
  }
  func.func @transform_0(%arg0: i32) -> (i32, i32) {
    %c0_i32 = arith.constant 0 : i32
    %c0_i32_0 = arith.constant 0 : i32
    return %arg0, %c0_i32 : i32, i32
  }
  func.func @transform_1(%arg0: i32) -> (i32, i32) {
    %c0_i32 = arith.constant 0 : i32
    %c0_i32_0 = arith.constant 0 : i32
    %c0_i32_1 = arith.constant 0 : i32
    return %c0_i32, %c0_i32_0 : i32, i32
  }
  func.func @transform_2(%arg0: i32) -> (i32, i32) {
    %c0_i32 = arith.constant 0 : i32
    %c0_i32_0 = arith.constant 0 : i32
    %c0_i32_1 = arith.constant 0 : i32
    return %c0_i32, %c0_i32_0 : i32, i32
  }
  func.func @transform_3(%arg0: i32) -> (i32, i32) {
    %c0_i32 = arith.constant 0 : i32
    %c0_i32_0 = arith.constant 0 : i32
    return %arg0, %c0_i32 : i32, i32
  }
}

</mosaic_0001>

<bundles_post_ra>
// kernel: mnist_svm_forward.1
= control target key start
LH: loop header
LB: loop body
LE: loop exit
PB: predicated region body
PF: predicated region fallthrough
CT: control target
= control target key end

     0   :  { %v823_v44 = vmov 0.0   ;;  %vm824_vm0 = vmmov 0   ;;  %s1029_s0 = inlined_call_operand.vmem [shape: f32[8,784], index: 0, kind: input, shape index: {}]   ;;  %s1030_s1 = inlined_call_operand.vmem [shape: bf16[784,128], index: 1, kind: input, shape index: {}]   ;;  %s1031_s2 = inlined_call_operand.vmem [shape: f32[1,128], index: 2, kind: input, shape index: {}]   ;;  %s1032_s3 = inlined_call_operand.hbm [shape: f32[8,128], index: 3, kind: output, shape index: {}]  }
   0x1   :  { %v746_v0 = vld [vmem:[%s1030_s1 + $0x40] sm:$0xff]   ;;  %v750_v4 = vld [vmem:[%s1030_s1 + $0x48] sm:$0xff]   ;;  %v754_v8 = vld [vmem:[%s1030_s1 + $0x50] sm:$0xff]  }
   0x2   :  { %v747_v1 = vld [vmem:[%s1030_s1] sm:$0xff]   ;;  %669 = vmatprep.subr.bf16.mxu0 %v746_v0  ;;  %v751_v5 = vld [vmem:[%s1030_s1 + $0x8] sm:$0xff]   ;;  %v755_v9 = vld [vmem:[%s1030_s1 + $0x10] sm:$0xff]  }
   0x3   :  { %v748_v2 = vld [vmem:[%s1030_s1 + $0xc0] sm:$0xff]   ;;  %670 = vmatpush3.bf16.msra.mxu0 %v747_v1  ;;  %v752_v6 = vld [vmem:[%s1030_s1 + $0xc8] sm:$0xff]   ;;  %v756_v10 = vld [vmem:[%s1030_s1 + $0xd0] sm:$0xff]  }
   0x4   :  { %v749_v3 = vld [vmem:[%s1030_s1 + $0x80] sm:$0xff]   ;;  %691 = vmatprep.subr.bf16.mxu1 %v748_v2  ;;  %671 = vmatprep.subr.bf16.mxu0 %v750_v4  ;;  %v753_v7 = vld [vmem:[%s1030_s1 + $0x88] sm:$0xff]   ;;  %v757_v11 = vld [vmem:[%s1030_s1 + $0x90] sm:$0xff]  }
   0x5   :  { %692 = vmatpush3.bf16.msra.mxu1 %v749_v3  ;;  %v758_v12 = vld [vmem:[%s1030_s1 + $0x58] sm:$0xff]   ;;  %v762_v16 = vld [vmem:[%s1030_s1 + $0x60] sm:$0xff]   ;;  %v766_v20 = vld [vmem:[%s1030_s1 + $0x68] sm:$0xff]  }
   0x6   :  { %693 = vmatprep.subr.bf16.mxu1 %v752_v6  ;;  %v759_v13 = vld [vmem:[%s1030_s1 + $0x18] sm:$0xff]   ;;  %v763_v17 = vld [vmem:[%s1030_s1 + $0x20] sm:$0xff]   ;;  %v767_v21 = vld [vmem:[%s1030_s1 + $0x28] sm:$0xff]  }
   0x7   :  { %672 = vmatpush3.bf16.msra.mxu0 %v751_v5  ;;  %v760_v14 = vld [vmem:[%s1030_s1 + $0xd8] sm:$0xff]   ;;  %v764_v18 = vld [vmem:[%s1030_s1 + $0xe0] sm:$0xff]   ;;  %v768_v22 = vld [vmem:[%s1030_s1 + $0xe8] sm:$0xff]  }
   0x8   :  { %673 = vmatprep.subr.bf16.mxu0 %v754_v8  ;;  %v761_v15 = vld [vmem:[%s1030_s1 + $0x98] sm:$0xff]   ;;  %v765_v19 = vld [vmem:[%s1030_s1 + $0xa0] sm:$0xff]   ;;  %v769_v23 = vld [vmem:[%s1030_s1 + $0xa8] sm:$0xff]  }
   0x9   :  { %694 = vmatpush3.bf16.msra.mxu1 %v753_v7  ;;  %v770_v24 = vld [vmem:[%s1030_s1 + $0x70] sm:$0xff]   ;;  %v774_v28 = vld [vmem:[%s1030_s1 + $0x78] sm:$0xff]   ;;  %v17_v31 = vld [vmem:[%s1029_s0 + $0x8] sm:$0xff] }
   0xa   :  { %695 = vmatprep.subr.bf16.mxu1 %v756_v10  ;;  %v771_v25 = vld [vmem:[%s1030_s1 + $0x30] sm:$0xff]   ;;  %v775_v29 = vld [vmem:[%s1030_s1 + $0x38] sm:$0xff]   ;;  %v24_v32 = vpack.c.bf16 %v17_v31, %v17_v31  ;;  %v16_v34 = vld [vmem:[%s1029_s0] sm:$0xff] }
   0xb   :  { %674 = vmatpush3.bf16.msra.mxu0 %v755_v9  ;;  %v772_v26 = vld [vmem:[%s1030_s1 + $0xf0] sm:$0xff]   ;;  %v776_v30 = vld [vmem:[%s1030_s1 + $0xf8] sm:$0xff]   ;;  %v23_v35 = vpack.c.bf16 %v16_v34, %v16_v34  ;;  %v778_v36 = vld [vmem:[%s1030_s1 + $0x140] sm:$0xff]  }
   0xc   :  { %675 = vmatprep.subr.bf16.mxu0 %v758_v12  ;;  %v773_v27 = vld [vmem:[%s1030_s1 + $0xb0] sm:$0xff]   ;;  %v777_v33 = vld [vmem:[%s1030_s1 + $0xb8] sm:$0xff]   ;;  %465 = vmatprep.mubr.bf16.mxu0 %v24_v32  ;;  %v779_v39 = vld [vmem:[%s1030_s1 + $0x100] sm:$0xff]  }
   0xd   :  { %696 = vmatpush3.bf16.msra.mxu1 %v757_v11  ;;  %v19_v37 = vld [vmem:[%s1029_s0 + $0x18] sm:$0xff]  ;;  %v18_v40 = vld [vmem:[%s1029_s0 + $0x10] sm:$0xff]  ;;  %v780_v42 = vld [vmem:[%s1030_s1 + $0x148] sm:$0xff]  }
   0xe   :  { %697 = vmatprep.subr.bf16.mxu1 %v760_v14  ;;  %v26_v38 = vpack.c.bf16 %v19_v37, %v19_v37  ;;  %v25_v41 = vpack.c.bf16 %v18_v40, %v18_v40  ;;  %v781_v43 = vld [vmem:[%s1030_s1 + $0x108] sm:$0xff]   ;;  %v782_v45 = vld [vmem:[%s1030_s1 + $0x150] sm:$0xff]   ;;  %v784_v47 = vld [vmem:[%s1030_s1 + $0x158] sm:$0xff]  }
   0xf   :  { %676 = vmatpush3.bf16.msra.mxu0 %v759_v13  ;;  %v783_v46 = vld [vmem:[%s1030_s1 + $0x110] sm:$0xff]   ;;  %v785_v48 = vld [vmem:[%s1030_s1 + $0x118] sm:$0xff]   ;;  %v786_v49 = vld [vmem:[%s1030_s1 + $0x160] sm:$0xff]  }
  0x10   :  { %677 = vmatprep.subr.bf16.mxu0 %v762_v16  ;;  %505 = vmatprep.mubr.bf16.mxu1 %v26_v38  ;;  %v787_v50 = vld [vmem:[%s1030_s1 + $0x120] sm:$0xff]   ;;  %v788_v51 = vld [vmem:[%s1030_s1 + $0x168] sm:$0xff]   ;;  %v22_v55 = vld [vmem:[%s1029_s0 + $0x30] sm:$0xff] }
  0x11   :  { %698 = vmatpush3.bf16.msra.mxu1 %v761_v15  ;;  %v794_v52 = vld [vmem:[%s1030_s1 + $0x180] sm:$0xff]   ;;  %v21_v53 = vld [vmem:[%s1029_s0 + $0x28] sm:$0xff] }
  0x12   :  { %699 = vmatprep.subr.bf16.mxu1 %v764_v18  ;;  %v28_v54 = vpack.c.bf16 %v21_v53, %v21_v53 }
  0x13   :  { %678 = vmatpush3.bf16.msra.mxu0 %v763_v17 }
  0x14   :  { %679 = vmatprep.subr.bf16.mxu0 %v766_v20 }
  0x15   :  { %700 = vmatpush3.bf16.msra.mxu1 %v765_v19 }
  0x16   :  { %701 = vmatprep.subr.bf16.mxu1 %v768_v22 }
  0x17   :  { %680 = vmatpush3.bf16.msra.mxu0 %v767_v21 }
  0x18   :  { %681 = vmatprep.subr.bf16.mxu0 %v770_v24 }
  0x19   :  { %702 = vmatpush3.bf16.msra.mxu1 %v769_v23 }
  0x1a   :  { %703 = vmatprep.subr.bf16.mxu1 %v772_v26 }
  0x1b   :  { %682 = vmatpush3.bf16.msra.mxu0 %v771_v25 }
  0x1c   :  { %683 = vmatprep.subr.bf16.mxu0 %v774_v28 }
  0x1d   :  { %704 = vmatpush3.bf16.msra.mxu1 %v773_v27 }
  0x1e   :  { %705 = vmatprep.subr.bf16.mxu1 %v776_v30 }
  0x1f   :  { %684 = vmatpush3.bf16.msra.mxu0 %v775_v29 }
  0x20   :  { %713 = vmatprep.subr.bf16.mxu0 %v778_v36 }
  0x21   :  { %706 = vmatpush3.bf16.msra.mxu1 %v777_v33 }
  0x22   :  { %466 = vmatmul.mubr.bf16.vlgmr.msra.gmra.mrb[0].mxu0 %v23_v35  ;;  %737 = vmatprep.subr.bf16.mxu1 %v823_v44 }
  0x23   :  { %714 = vmatpush3.bf16.msra.mxu0 %v779_v39 }
  0x24   :  { %506 = vmatmul.mubr.bf16.vlgmr.msra.gmra.mrb[0].mxu1 %v25_v41  ;;  %715 = vmatprep.subr.bf16.mxu0 %v780_v42 }
  0x25   :  { %739 = vmatprep.mubr.msk.bf16.mxu1 %vm824_vm0, %v823_v44 }
  0x27   :  { %716 = vmatpush3.bf16.msra.mxu0 %v781_v43 }
  0x28   :  { %717 = vmatprep.subr.bf16.mxu0 %v782_v45 }
  0x2b   :  { %718 = vmatpush3.bf16.msra.mxu0 %v783_v46 }
  0x2c   :  { %719 = vmatprep.subr.bf16.mxu0 %v784_v47 }
  0x2f   :  { %720 = vmatpush3.bf16.msra.mxu0 %v785_v48 }
  0x30   :  { %721 = vmatprep.subr.bf16.mxu0 %v786_v49 }
  0x31   :  { %8 = vsyncpa [#allocation3], 0  ;;  %v789_v56 = vld [vmem:[%s1030_s1 + $0x128] sm:$0xff]   ;;  %738 = vmatpush3.bf16.msra.mxu1 %v794_v52  ;;  %v29_v57 = vpack.c.bf16 %v22_v55, %v22_v55  ;;  %vm429_vm1 = vcmask 130048   ;;  %v790_v58 = vld [vmem:[%s1030_s1 + $0x170] sm:$0xff]   ;;  %545 = vmatprep.mubr.bf16.mxu0 %v28_v54 }
  0x32   :  { %v791_v59 = vld [vmem:[%s1030_s1 + $0x130] sm:$0xff]   ;;  %v792_v60 = vld [vmem:[%s1030_s1 + $0x178] sm:$0xff]   ;;  %v20_v62 = vld [vmem:[%s1029_s0 + $0x20] sm:$0xff]  ;;  %s825_s0 = smov [#allocation2]  }
  0x33   :  { %722 = vmatpush3.bf16.msra.mxu0 %v787_v50  ;;  %v793_v61 = vld [vmem:[%s1030_s1 + $0x138] sm:$0xff]   ;;  %v27_v63 = vpack.c.bf16 %v20_v62, %v20_v62  ;;  %v618_v1 = vld [vmem:[%s1031_s2] ss:$0 sm:$0xff]  ;;  %s610_s1 = sshll.u32 %s825_s0, 4  ;;  %s611_s1 = int_to_ptr.vmem [resolvable:$true] %s610_s1 }
  0x34   :  { %723 = vmatprep.subr.bf16.mxu0 %v788_v51  ;;  %740 = vmatmul.mubr.msk.bf16.vlgmr.msra.gmra.mrb[4].mxu1 %vm429_vm1, %v29_v57  ;;  %s799_s2 = scalar_lea.vmem %s611_s1, 128  ;;  %p804_p1 = scmp.lt.s32.totalorder %s611_s1, %s611_s1 }
  0x35   :  { %p800_p0 = scmp.ne.s32.totalorder %s611_s1, %s799_s2  ;;  %p805_p2 = scmp.lt.s32.totalorder %s799_s2, %s799_s2 }
  0x37   :  { %724 = vmatpush3.bf16.msra.mxu0 %v789_v56  ;;  %p806_p3 = por %p805_p2, %p804_p1 }
  0x38   :  { %725 = vmatprep.subr.bf16.mxu0 %v790_v58 }
  0x39   :  { %p807_p4 = pnand %p806_p3, %p800_p0 }
  0x3b   :  { %726 = vmatpush3.bf16.msra.mxu0 %v791_v59 }
  0x3c   :  { %727 = vmatprep.subr.bf16.mxu0 %v792_v60 }
  0x3f   :  { %728 = vmatpush3.bf16.msra.mxu0 %v793_v61 }
  0x42   :  { %546 = vmatmul.mubr.bf16.vlgmr.msra.gmra.mrb[4].mxu0 %v27_v63 }
  0xf5   :  { %v685_v0 = vpop.f32.mrb[0].mxu0 }
  0xf6   :  { %v686_v2 = vpop.f32.mrb[1].mxu0 }
  0xf7   :  { %v687_v3 = vadd.f32 %v686_v2, %v685_v0  ;;  %v688_v4 = vpop.f32.mrb[2].mxu0  ;;  %v707_v5 = vpop.f32.mrb[0].mxu1 }
  0xf8   :  { %v689_v6 = vpop.f32.mrb[3].mxu0  ;;  %v708_v8 = vpop.f32.mrb[1].mxu1 }
  0xf9   :  { %v468_v7 = vadd.f32 %v687_v3, %v618_v1  ;;  %v709_v9 = vadd.f32 %v708_v8, %v707_v5  ;;  %v710_v10 = vpop.f32.mrb[2].mxu1 }
  0xfa   :  { %v711_v11 = vpop.f32.mrb[3].mxu1 }
  0xfb   :  { %v508_v12 = vadd.f32 %v709_v9, %v468_v7 }
 0x107   :  { %v587_v13 = vpop.f32.mrb[4].mxu1 }
 0x108   :  { %v741_v14 = vpop.f32.mrb[5].mxu1 }
 0x109   :  { %v590_v15 = vpop.f32.mrb[6].mxu1 }
 0x10a   :  { %v742_v16 = vpop.f32.mrb[7].mxu1 }
 0x115   :  { %v729_v17 = vpop.f32.mrb[4].mxu0 }
 0x116   :  { %v730_v18 = vpop.f32.mrb[5].mxu0 }
 0x117   :  { %v731_v19 = vadd.f32 %v730_v18, %v729_v17  ;;  %v732_v20 = vpop.f32.mrb[6].mxu0 }
 0x118   :  { %v733_v21 = vpop.f32.mrb[7].mxu0 }
 0x119   :  { %v548_v22 = vadd.f32 %v731_v19, %v508_v12 }
 0x11b   :  { %v588_v23 = vadd.f32 %v587_v13, %v548_v22 }
 0x11d   :  { %593 = vmax.xlane.f32.xlu0 %v588_v23 }
 0x1aa   :  { %v594_v24 = vpop.xlane.xlu0 %593 }
 0x1ab   :  { %v595_v25 = vsub.f32 %v588_v23, %v594_v24 }
 0x1ad   :  { %v596_v26 = vmul.f32 1.442695, %v595_v25 }
 0x1af   :  { %795 = vpow2.f32 %v596_v26 }
 0x1b9   :  { %v796_v27 = vpop.eup %795 }
 0x1ba   :  { %598 = vadd.xlane.f32.xlu0 %v796_v27 }
 0x247   :  { %v599_v28 = vpop.xlane.xlu0 %598 }
 0x248   :  { %797 = vlog2.f32 %v599_v28 }
 0x252   :  { %v798_v29 = vpop.eup %797 }
 0x253   :  { %v601_v30 = vmul.f32 0.6931472, %v798_v29 }
 0x255   :  { %v602_v31 = vsub.f32 %v595_v25, %v601_v30 }
 0x257   :  { %603 = vst [vmem:[#allocation2] sm:$0xff] %v602_v31 }
 0x258   :  { %810 = shalt.err (!%p807_p4)
}
 0x259   :  { %s811_s20 = scalar_lea.hbm %s1032_s3, 128 }
 0x25a   :  { %p812_p5 = scmp.ne.s32.totalorder %s1032_s3, %s811_s20  ;;  %p815_p6 = scmp.lt.u32.totalorder %s811_s20, %s1032_s3 }
 0x25c   :  { %p817_p7 = pnand %p815_p6, %p812_p5 }
 0x25e   :  { %820 = shalt.err (!%p817_p7)
}
 0x25f   :  { %613 = dma.vmem_to_hbm [thread:$0]  %s611_s1, 128, %s1032_s3, [#allocation3]  }
 0x260   :  { %821 = dma.done.wait [#allocation3], 128  }
 0x261   :  { %822 = vsyncadd [#allocation3], 4294967168 }
 0x262   :  { %617 = vsyncpa [#allocation3], 1 }

</bundles_post_ra>
